<compile_context>
chip_gen: v7x
topology: tpu7x:2x2x1
jax: 0.10.0
libtpu: 0.0.40
codegen_flags: <defaults>
</compile_context>

<pallas_src>
import functools

import jax
import jax.numpy as jnp
from jax.experimental import pallas as pl
from jax.experimental.pallas import tpu as pltpu


_LANE = 1024                              # wide lane-dense output slab
_TARGET_BLOCK_BYTES = 2 * 1024 * 1024     # ~2 MiB per input block per grid step


def _poly_envelope_kernel(d_ref, o_ref, *, p, a, b, c):
    # Load in native dtype, compute in f32, store back in native dtype.
    d = d_ref[...].astype(jnp.float32)
    d_pow = d ** p                                    # integer pow -> a few VPU muls
    env = 1.0 + d_pow * (a + d * (b + c * d))         # Horner on high-order terms
    o_ref[...] = jnp.where(d < 1.0, env, 0.0).astype(o_ref.dtype)


def _round_up(x: int, m: int) -> int:
    return ((x + m - 1) // m) * m


def polynomial_envelope(d_scaled: jax.Array, exponent: int) -> jax.Array:
    """Apply the polynomial envelope elementwise via a Pallas TPU kernel."""
    assert exponent > 0
    p = int(exponent)
    a = -(p + 1) * (p + 2) / 2.0
    b = float(p * (p + 2))
    c = -p * (p + 1) / 2.0

    orig_shape = d_scaled.shape
    orig_dtype = d_scaled.dtype
    # Keep native (possibly sub-f32) floating dtype through HBM; math is f32 in-kernel.
    io_dtype = orig_dtype if jnp.issubdtype(orig_dtype, jnp.floating) else jnp.float32
    flat = d_scaled.reshape(-1).astype(io_dtype)
    n = flat.shape[0]
    itemsize = jnp.dtype(io_dtype).itemsize

    # Block sizing: ~2 MiB per block, sublane-count a multiple of 8.
    block_rows_target = max(8, _TARGET_BLOCK_BYTES // (_LANE * itemsize))
    rows_needed = max(1, pl.cdiv(n, _LANE))
    if rows_needed <= block_rows_target:
        block_rows = _round_up(rows_needed, 8)
        rows = block_rows                       # single block covers everything
    else:
        block_rows = block_rows_target
        rows = _round_up(rows_needed, block_rows)   # exact grid division, no lost tail
    n_pad = rows * _LANE

    if n_pad != n:
        # Pad value 0 -> env(0) = 1, but padded region is sliced off below.
        flat = jnp.pad(flat, (0, n_pad - n))
    x2d = flat.reshape(rows, _LANE)

    grid = (rows // block_rows,)
    kernel = functools.partial(_poly_envelope_kernel, p=p, a=a, b=b, c=c)

    out2d = pl.pallas_call(
        kernel,
        out_shape=jax.ShapeDtypeStruct((rows, _LANE), io_dtype),
        grid_spec=pl.GridSpec(
            grid=grid,
            in_specs=[pl.BlockSpec((block_rows, _LANE), lambda i: (i, 0))],
            out_specs=pl.BlockSpec((block_rows, _LANE), lambda i: (i, 0)),
        ),
        compiler_params=pltpu.CompilerParams(
            dimension_semantics=("parallel",),
        ),
    )(x2d)

    out = out2d.reshape(-1)
    if n_pad != n:
        out = out[:n]
    return out.reshape(orig_shape).astype(orig_dtype)


def _reference(d_scaled: jax.Array, exponent: int) -> jax.Array:
    p = exponent
    a = -(p + 1) * (p + 2) / 2.0
    b = float(p * (p + 2))
    c = -p * (p + 1) / 2.0
    env = 1.0 + a * d_scaled ** p + b * d_scaled ** (p + 1) + c * d_scaled ** (p + 2)
    return jnp.where(d_scaled < 1.0, env, jnp.zeros_like(d_scaled))


if __name__ == "__main__":
    key = jax.random.PRNGKey(0)
    # Small "number of edges" input of scaled distances; some values >= 1 so
    # the cutoff branch is exercised.
    num_edges = 100
    d_scaled = jax.random.uniform(
        key, (num_edges,), dtype=jnp.float32, minval=0.0, maxval=1.5
    )

    exponent = 5
    out = polynomial_envelope(d_scaled, exponent)
    out = jax.block_until_ready(out)

    ref = _reference(d_scaled, exponent)
    assert out.shape == d_scaled.shape
    assert out.dtype == d_scaled.dtype
    assert jnp.allclose(out, ref, atol=1e-5, rtol=1e-5), "mismatch vs reference"

    print("KERNEL_OK")
</pallas_src>

<mosaic_0001>
module attributes {stable_mosaic.version = 11 : i64} {
  func.func @_poly_envelope_kernel(%arg0: i32, %arg1: memref<8x1024xf32, #tpu.memory_space<vmem>>, %arg2: memref<8x1024xf32, #tpu.memory_space<vmem>>) attributes {dimension_semantics = [#tpu.dimension_semantics<parallel>], iteration_bounds = array<i64: 1>, scalar_prefetch = 0 : i64, scratch_operands = 0 : i64, tpu.core_type = #tpu.core_type<tc>, window_params = [{transform_indices = @transform_0, window_bounds = array<i64: 8, 1024>}, {transform_indices = @transform_1, window_bounds = array<i64: 8, 1024>}]} {
    %c0 = arith.constant 0 : index
    %c0_0 = arith.constant 0 : index
    %0 = vector.load %arg1[%c0, %c0_0] : memref<8x1024xf32, #tpu.memory_space<vmem>>, vector<8x1024xf32>
    %1 = arith.mulf %0, %0 : vector<8x1024xf32>
    %2 = arith.mulf %1, %1 : vector<8x1024xf32>
    %3 = arith.mulf %0, %2 : vector<8x1024xf32>
    %cst = arith.constant -1.500000e+01 : f32
    %4 = vector.broadcast %cst : f32 to vector<8x1024xf32>
    %5 = arith.mulf %4, %0 : vector<8x1024xf32>
    %cst_1 = arith.constant 3.500000e+01 : f32
    %6 = vector.broadcast %cst_1 : f32 to vector<8x1024xf32>
    %7 = arith.addf %6, %5 : vector<8x1024xf32>
    %8 = arith.mulf %0, %7 : vector<8x1024xf32>
    %cst_2 = arith.constant -2.100000e+01 : f32
    %9 = vector.broadcast %cst_2 : f32 to vector<8x1024xf32>
    %10 = arith.addf %9, %8 : vector<8x1024xf32>
    %11 = arith.mulf %3, %10 : vector<8x1024xf32>
    %cst_3 = arith.constant 1.000000e+00 : f32
    %12 = vector.broadcast %cst_3 : f32 to vector<8x1024xf32>
    %13 = arith.addf %12, %11 : vector<8x1024xf32>
    %cst_4 = arith.constant 1.000000e+00 : f32
    %14 = vector.broadcast %cst_4 : f32 to vector<8x1024xf32>
    %15 = arith.cmpf olt, %0, %14 : vector<8x1024xf32>
    %cst_5 = arith.constant 0.000000e+00 : f32
    %16 = vector.broadcast %cst_5 : f32 to vector<8x1024xf32>
    %17 = arith.select %15, %13, %16 : vector<8x1024xi1>, vector<8x1024xf32>
    %c0_6 = arith.constant 0 : index
    %c0_7 = arith.constant 0 : index
    %18 = vector.load %arg2[%c0_6, %c0_7] : memref<8x1024xf32, #tpu.memory_space<vmem>>, vector<8x1024xf32>
    tpu.vector_store %arg2[%c0_6, %c0_7], %17 {strides = array<i32>} : memref<8x1024xf32, #tpu.memory_space<vmem>>, vector<8x1024xf32>,
    return
  }
  func.func @transform_0(%arg0: i32) -> (i32, i32) {
    %c0_i32 = arith.constant 0 : i32
    %c0_i32_0 = arith.constant 0 : i32
    return %arg0, %c0_i32 : i32, i32
  }
  func.func @transform_1(%arg0: i32) -> (i32, i32) {
    %c0_i32 = arith.constant 0 : i32
    %c0_i32_0 = arith.constant 0 : i32
    return %arg0, %c0_i32 : i32, i32
  }
}

</mosaic_0001>

<bundles_post_ra>
// kernel: tpu_custom_call.1
= control target key start
LH: loop header
LB: loop body
LE: loop exit
PB: predicated region body
PF: predicated region fallthrough
CT: control target
= control target key end

     0   :  { %6 = vsyncpa [#allocation3], 0  ;;  %s247_s0 = inlined_call_operand.hbm [shape: f32[8,1024], index: 0, kind: input, shape index: {}]   ;;  %s248_s1 = inlined_call_operand.hbm [shape: f32[8,1024], index: 1, kind: output, shape index: {}]  }
   0x1   :  { %7 = vsyncpa [#allocation4], 0  ;;  %s190_s6 = smov [#allocation2]   ;;  %s142_s10 = scalar_lea.hbm %s247_s0, 1024 }
   0x2   :  { %s14_s7 = sshll.u32 %s190_s6, 4  ;;  %p143_p0 = scmp.ne.s32.totalorder %s247_s0, %s142_s10  ;;  %s15_s7 = int_to_ptr.vmem [resolvable:$true] %s14_s7 }
   0x3   :  { %p146_p1 = scmp.lt.u32.totalorder %s142_s10, %s247_s0 }
   0x5   :  { %p148_p2 = pnand %p146_p1, %p143_p0 }
   0x7   :  { %151 = shalt.err (!%p148_p2)
}
   0x8   :  { %s152_s15 = scalar_lea.vmem %s15_s7, 1024  ;;  %p157_p4 = scmp.lt.s32.totalorder %s15_s7, %s15_s7 }
   0x9   :  { %p153_p3 = scmp.ne.s32.totalorder %s15_s7, %s152_s15  ;;  %p158_p5 = scmp.lt.s32.totalorder %s152_s15, %s152_s15 }
   0xb   :  { %p159_p6 = por %p158_p5, %p157_p4 }
   0xd   :  { %p160_p7 = pnand %p159_p6, %p153_p3 }
   0xf   :  { %163 = shalt.err (!%p160_p7)
}
  0x10   :  { %17 = dma.hbm_to_vmem [thread:$0]  %s247_s0, 1024, %s15_s7, [#allocation3]  }
  0x11   :  { %186 = dma.done.wait [#allocation3], 1024  }
  0x12   :  { %187 = vsyncadd [#allocation3], 4294966272  ;;  %v21_v0 = vld [vmem:[#allocation2] sm:$0xff]  ;;  %v22_v1 = vld [vmem:[#allocation2 + $0x8] sm:$0xff]  ;;  %s191_s0 = smov [#allocation5]  }
  0x13   :  { %v23_v2 = vld [vmem:[#allocation2 + $0x10] sm:$0xff]  ;;  %v29_v3 = vmul.f32 %v21_v0, %v21_v0  ;;  %v53_v4 = vmul.f32 -15.0, %v21_v0  ;;  %v30_v5 = vmul.f32 %v22_v1, %v22_v1  ;;  %v54_v6 = vmul.f32 -15.0, %v22_v1  ;;  %v214_v9 = vld [vmem:[#allocation2 + $0x18] sm:$0xff]  ;;  %v219_v21 = vld [vmem:[#allocation2 + $0x20] sm:$0xff]  ;;  %s131_s18 = sshll.u32 %s191_s0, 4  ;;  %s132_s18 = int_to_ptr.vmem [resolvable:$true] %s131_s18 }
  0x14   :  { %v31_v7 = vmul.f32 %v23_v2, %v23_v2  ;;  %v55_v8 = vmul.f32 -15.0, %v23_v2  ;;  %vm101_vm0 = vcmp.lt.f32.partialorder %v21_v0, 1.0  ;;  %v32_v16 = vmul.f32 %v214_v9, %v214_v9  ;;  %v26_v32 = vld [vmem:[#allocation2 + $0x28] sm:$0xff]  ;;  %v27_v49 = vld [vmem:[#allocation2 + $0x30] sm:$0xff]  ;;  %v28_v53 = vld [vmem:[#allocation2 + $0x38] sm:$0xff]  ;;  %s164_s19 = scalar_lea.vmem %s132_s18, 1024  ;;  %p169_p9 = scmp.lt.s32.totalorder %s132_s18, %s132_s18 }
  0x15   :  { %v37_v10 = vmul.f32 %v29_v3, %v29_v3  ;;  %v61_v11 = vadd.f32 35.0, %v53_v4  ;;  %v38_v12 = vmul.f32 %v30_v5, %v30_v5  ;;  %v62_v13 = vadd.f32 35.0, %v54_v6  ;;  %p165_p8 = scmp.ne.s32.totalorder %s132_s18, %s164_s19  ;;  %p170_p10 = scmp.lt.s32.totalorder %s164_s19, %s164_s19 }
  0x16   :  { %v39_v14 = vmul.f32 %v31_v7, %v31_v7  ;;  %v63_v15 = vadd.f32 35.0, %v55_v8  ;;  %v56_v20 = vmul.f32 -15.0, %v214_v9  ;;  %v40_v25 = vmul.f32 %v32_v16, %v32_v16 }
  0x17   :  { %v45_v17 = vmul.f32 %v37_v10, %v21_v0  ;;  %v69_v18 = vmul.f32 %v61_v11, %v21_v0  ;;  %v46_v19 = vmul.f32 %v38_v12, %v22_v1  ;;  %v70_v22 = vmul.f32 %v62_v13, %v22_v1  ;;  %p171_p11 = por %p170_p10, %p169_p9 }
  0x18   :  { %v47_v23 = vmul.f32 %v39_v14, %v23_v2  ;;  %v71_v24 = vmul.f32 %v63_v15, %v23_v2  ;;  %vm102_vm1 = vcmp.lt.f32.partialorder %v22_v1, 1.0  ;;  %v64_v27 = vadd.f32 35.0, %v56_v20 }
  0x19   :  { %v77_v26 = vadd.f32 -21.0, %v69_v18  ;;  %v33_v28 = vmul.f32 %v219_v21, %v219_v21  ;;  %v78_v29 = vadd.f32 -21.0, %v70_v22  ;;  %vm103_vm2 = vcmp.lt.f32.partialorder %v23_v2, 1.0  ;;  %p172_p12 = pnand %p171_p11, %p165_p8 }
  0x1a   :  { %v79_v30 = vadd.f32 -21.0, %v71_v24  ;;  %v57_v31 = vmul.f32 -15.0, %v219_v21  ;;  %v48_v34 = vmul.f32 %v40_v25, %v214_v9  ;;  %v72_v35 = vmul.f32 %v64_v27, %v214_v9 }
  0x1b   :  { %v85_v33 = vmul.f32 %v77_v26, %v45_v17  ;;  %v41_v36 = vmul.f32 %v33_v28, %v33_v28  ;;  %v86_v37 = vmul.f32 %v78_v29, %v46_v19  ;;  %v34_v40 = vmul.f32 %v26_v32, %v26_v32 }
  0x1c   :  { %v87_v38 = vmul.f32 %v79_v30, %v47_v23  ;;  %v65_v39 = vadd.f32 35.0, %v57_v31  ;;  %v80_v42 = vadd.f32 -21.0, %v72_v35  ;;  %v58_v44 = vmul.f32 -15.0, %v26_v32 }
  0x1d   :  { %v93_v41 = vadd.f32 1.0, %v85_v33  ;;  %v49_v43 = vmul.f32 %v41_v36, %v219_v21  ;;  %v94_v45 = vadd.f32 1.0, %v86_v37  ;;  %v42_v48 = vmul.f32 %v34_v40, %v34_v40 }
  0x1e   :  { %v95_v46 = vadd.f32 1.0, %v87_v38  ;;  %v73_v47 = vmul.f32 %v65_v39, %v219_v21  ;;  %v88_v51 = vmul.f32 %v80_v42, %v48_v34  ;;  %vm104_vm3 = vcmp.lt.f32.partialorder %v214_v9, 1.0 }
  0x1f   :  { %v109_v50 = vsel %vm101_vm0, %v93_v41, 0.0  ;;  %v66_v52 = vadd.f32 35.0, %v58_v44  ;;  %v110_v54 = vsel %vm102_vm1, %v94_v45, 0.0  ;;  %v50_v57 = vmul.f32 %v42_v48, %v26_v32 }
  0x20   :  { %117 = vst [vmem:[#allocation5] sm:$0xff] %v109_v50  ;;  %v111_v55 = vsel %vm103_vm2, %v95_v46, 0.0  ;;  %v81_v56 = vadd.f32 -21.0, %v73_v47  ;;  %118 = vst [vmem:[#allocation5 + $0x8] sm:$0xff] %v110_v54  ;;  %v96_v58 = vadd.f32 1.0, %v88_v51  ;;  %v35_v60 = vmul.f32 %v27_v49, %v27_v49 }
  0x21   :  { %119 = vst [vmem:[#allocation5 + $0x10] sm:$0xff] %v111_v55  ;;  %v74_v59 = vmul.f32 %v66_v52, %v26_v32  ;;  %v59_v61 = vmul.f32 -15.0, %v27_v49  ;;  %vm105_vm4 = vcmp.lt.f32.partialorder %v219_v21, 1.0  ;;  %v36_v63 = vmul.f32 %v28_v53, %v28_v53 }
  0x22   :  { %v89_v62 = vmul.f32 %v81_v56, %v49_v43  ;;  %v60_v0 = vmul.f32 -15.0, %v28_v53  ;;  %v112_v3 = vsel %vm104_vm3, %v96_v58, 0.0  ;;  %v43_v4 = vmul.f32 %v35_v60, %v35_v60 }
  0x23   :  { %v82_v1 = vadd.f32 -21.0, %v74_v59  ;;  %v67_v2 = vadd.f32 35.0, %v59_v61  ;;  %120 = vst [vmem:[#allocation5 + $0x18] sm:$0xff] %v112_v3  ;;  %v44_v6 = vmul.f32 %v36_v63, %v36_v63  ;;  %vm106_vm5 = vcmp.lt.f32.partialorder %v26_v32, 1.0 }
  0x24   :  { %v97_v5 = vadd.f32 1.0, %v89_v62  ;;  %v68_v7 = vadd.f32 35.0, %v60_v0  ;;  %v51_v10 = vmul.f32 %v43_v4, %v27_v49  ;;  %vm107_vm6 = vcmp.lt.f32.partialorder %v27_v49, 1.0 }
  0x25   :  { %v90_v8 = vmul.f32 %v82_v1, %v50_v57  ;;  %v75_v11 = vmul.f32 %v67_v2, %v27_v49  ;;  %v52_v13 = vmul.f32 %v44_v6, %v28_v53  ;;  %vm108_vm7 = vcmp.lt.f32.partialorder %v28_v53, 1.0 }
  0x26   :  { %v113_v12 = vsel %vm105_vm4, %v97_v5, 0.0  ;;  %v76_v14 = vmul.f32 %v68_v7, %v28_v53 }
  0x27   :  { %121 = vst [vmem:[#allocation5 + $0x20] sm:$0xff] %v113_v12  ;;  %v98_v15 = vadd.f32 1.0, %v90_v8  ;;  %v83_v16 = vadd.f32 -21.0, %v75_v11 }
  0x28   :  { %v84_v17 = vadd.f32 -21.0, %v76_v14 }
  0x29   :  { %v114_v9 = vsel %vm106_vm5, %v98_v15, 0.0  ;;  %v91_v18 = vmul.f32 %v83_v16, %v51_v10 }
  0x2a   :  { %122 = vst [vmem:[#allocation5 + $0x28] sm:$0xff] %v114_v9  ;;  %v92_v19 = vmul.f32 %v84_v17, %v52_v13 }
  0x2b   :  { %v99_v20 = vadd.f32 1.0, %v91_v18 }
  0x2c   :  { %v100_v21 = vadd.f32 1.0, %v92_v19 }
  0x2d   :  { %v115_v22 = vsel %vm107_vm6, %v99_v20, 0.0 }
  0x2e   :  { %123 = vst [vmem:[#allocation5 + $0x30] sm:$0xff] %v115_v22  ;;  %v116_v23 = vsel %vm108_vm7, %v100_v21, 0.0 }
  0x2f   :  { %124 = vst [vmem:[#allocation5 + $0x38] sm:$0xff] %v116_v23 }
  0x30   :  { %175 = shalt.err (!%p172_p12)
}
  0x31   :  { %s176_s22 = scalar_lea.hbm %s248_s1, 1024 }
  0x32   :  { %p177_p13 = scmp.ne.s32.totalorder %s248_s1, %s176_s22  ;;  %p180_p0 = scmp.lt.u32.totalorder %s176_s22, %s248_s1 }
  0x34   :  { %p182_p1 = pnand %p180_p0, %p177_p13 }
  0x36   :  { %185 = shalt.err (!%p182_p1)
}
  0x37   :  { %134 = dma.vmem_to_hbm [thread:$0]  %s132_s18, 1024, %s248_s1, [#allocation4]  }
  0x38   :  { %188 = dma.done.wait [#allocation4], 1024  }
  0x39   :  { %189 = vsyncadd [#allocation4], 4294966272 }
  0x3a   :  { %138 = vsyncpa [#allocation3], 1 }
  0x3b   :  { %139 = vsyncpa [#allocation4], 1 }

</bundles_post_ra>
